<compile_context>
chip_gen: v5e
topology: v5e:2x2
jax: 0.10.0
libtpu: 0.0.40
codegen_flags: <defaults>
</compile_context>

<pallas_src>
import functools

import jax
import jax.numpy as jnp
import numpy as np
from jax.experimental import pallas as pl
from jax.experimental.pallas import tpu as pltpu


# ----------------------------- sizing helpers -------------------------------

def _round_up(v, m):
    return (v + m - 1) // m * m


def _vmem_limit_bytes():
    """Generation-aware scoped-VMEM limit (~60% of physical VMEM)."""
    try:
        phys = pltpu.get_tpu_info().vmem_capacity_bytes
    except Exception:
        phys = 64 * 1024 * 1024  # conservative fallback (v7x-sized)
    return max(16 * 1024 * 1024, min(int(phys * 0.6), 100 * 1024 * 1024))


def _pick_row_tile(rows):
    """Sublane-dense row tile; >=2 tiles when possible (keeps both TCs busy)."""
    if rows < 16:
        return rows  # single full-extent block (any size == full dim is legal)
    half = (rows + 1) // 2
    return max(8, min(256, _round_up(half, 8)))


def _pick_hw_tile(hw, per_lane_bytes, budget, max_tile):
    """Largest multiple-of-128 lane tile fitting the budget (or full HW)."""
    cap = (budget // max(per_lane_bytes, 1)) // 128 * 128
    t = min(max(128, cap), max_tile)
    t = max(128, t // 128 * 128)
    if t >= hw:
        return hw  # one full-extent lane block: no tail, no masking needed
    return t       # multiple of 128; ragged last tile handled by masking


# ------------------------- fused single-pass kernel -------------------------

def _fused_kernel(w_ref, x_ref, o_ref, mp_ref, *, C, inv_hw, k, pad, base,
                  out_is_f32):
    # w_ref: (k,) f32 in SMEM (scalar prefetch)
    # x_ref / o_ref: (1, C, HW) blocks (one batch element)
    # mp_ref: (base + C + pad, 1) f32 VMEM scratch (zero-padded pooled vector)
    x = x_ref[...]                                                   # (1,C,HW)
    mean = jnp.sum(x.astype(jnp.float32), axis=2, keepdims=True) * inv_hw

    mp_ref[...] = jnp.zeros_like(mp_ref)
    mp_ref[pl.ds(base, C), :] = mean[0]                              # aligned store

    conv = jnp.zeros((C, 1), jnp.float32)
    for t in range(k):                                               # k-tap conv
        conv = conv + w_ref[t] * mp_ref[pl.ds(base + t - pad, C), :]
    gate = jax.nn.sigmoid(conv)[None]                                # (1,C,1)

    if out_is_f32:
        o_ref[...] = x.astype(jnp.float32) * gate
    else:
        o_ref[...] = (x * gate.astype(x.dtype)).astype(o_ref.dtype)


# --------------------------- two-pass fallback -------------------------------

def _pool_sum_kernel(x_ref, sum_ref, *, hw, hwt):
    # x_ref: (RT, HWT) tile; sum_ref: (RT, 1) f32 resident accumulator.
    j = pl.program_id(1)

    @pl.when(j == 0)
    def _():
        sum_ref[...] = jnp.zeros_like(sum_ref)

    x = x_ref[...].astype(jnp.float32)
    col = jax.lax.broadcasted_iota(jnp.int32, x.shape, 1)
    x = jnp.where(j * hwt + col < hw, x, 0.0)        # mask ragged lane tail
    sum_ref[...] += jnp.sum(x, axis=1, keepdims=True)


def _apply_gate_kernel(g_ref, x_ref, o_ref):
    # g_ref: (RT, 1); x_ref / o_ref: (RT, HWT).  Same dtype -> native math.
    o_ref[...] = x_ref[...] * g_ref[...]


# ------------------------------ host wrapper ---------------------------------

def nda_cam(x, conv_weight, kernel_size, *, _force_two_pass=False,
            _max_hw_tile=None):
    """ECA channel attention.  x: (B, C, H, W); conv_weight: (kernel_size,)."""
    B, C, H, W = x.shape
    HW = H * W
    k = int(kernel_size)
    pad = (k - 1) // 2
    w32 = jnp.asarray(conv_weight, jnp.float32).reshape(-1)

    vmem_limit = _vmem_limit_bytes()
    itemsize = jnp.dtype(x.dtype).itemsize
    out_is_f32 = jnp.dtype(x.dtype) == jnp.float32

    # ---------------- Fused single-pass path (1 read + 1 write of x) --------
    fused_bytes = (4 * itemsize + 4) * C * HW  # 2x in + 2x out blocks + temps
    if (not _force_two_pass) and fused_bytes <= vmem_limit // 2:
        x3 = x.reshape(B, C, HW)               # free reshape, no copy
        base = max(8, _round_up(pad, 8))
        kern = functools.partial(_fused_kernel, C=C, inv_hw=1.0 / float(HW),
                                 k=k, pad=pad, base=base, out_is_f32=out_is_f32)
        out3 = pl.pallas_call(
            kern,
            out_shape=jax.ShapeDtypeStruct((B, C, HW), x.dtype),
            grid_spec=pltpu.PrefetchScalarGridSpec(
                num_scalar_prefetch=1,
                grid=(B,),
                in_specs=[pl.BlockSpec((1, C, HW), lambda b, w: (b, 0, 0))],
                out_specs=pl.BlockSpec((1, C, HW), lambda b, w: (b, 0, 0)),
                scratch_shapes=[pltpu.VMEM((base + C + pad, 1), jnp.float32)]),
            compiler_params=pltpu.CompilerParams(
                dimension_semantics=("parallel",),
                vmem_limit_bytes=vmem_limit),
        )(w32, x3)
        return out3.reshape(B, C, H, W)

    # ---------------- Two-pass streaming path --------------------------------
    rows = B * C
    x2 = x.reshape(rows, HW)                    # free reshape, no copy

    rt = _pick_row_tile(rows)
    n_rt = pl.cdiv(rows, rt)
    budget = vmem_limit // 3
    max_tile = _max_hw_tile if _max_hw_tile is not None else (1 << 16)
    # Pass 1 double-buffers only the input (+ f32 temps); pass 2 also the out.
    hwt1 = _pick_hw_tile(HW, rt * (2 * itemsize + 4), budget, max_tile)
    hwt2 = _pick_hw_tile(HW, rt * (4 * itemsize), budget, max_tile)

    # ---- Pass 1: masked spatial sum into a resident f32 accumulator. ----
    pooled = pl.pallas_call(
        functools.partial(_pool_sum_kernel, hw=HW, hwt=hwt1),
        out_shape=jax.ShapeDtypeStruct((rows, 1), jnp.float32),
        grid_spec=pltpu.PrefetchScalarGridSpec(
            num_scalar_prefetch=0,
            grid=(n_rt, pl.cdiv(HW, hwt1)),
            in_specs=[pl.BlockSpec((rt, hwt1), lambda i, j: (i, j))],
            out_specs=pl.BlockSpec((rt, 1), lambda i, j: (i, 0))),
        compiler_params=pltpu.CompilerParams(
            dimension_semantics=("parallel", "arbitrary"),
            vmem_limit_bytes=vmem_limit),
    )(x2)

    # ---- Tiny per-channel gate math (O(B*C*k)); plain JAX, negligible. ----
    mean = pooled[:, 0].reshape(B, C) / float(HW)
    mean_pad = jnp.pad(mean, ((0, 0), (pad, pad)))
    conv = jnp.zeros((B, C), jnp.float32)
    for t in range(k):                                     # k-tap "same" conv
        conv = conv + w32[t] * mean_pad[:, t:t + C]
    gate = jax.nn.sigmoid(conv).reshape(rows, 1).astype(x.dtype)

    # ---- Pass 2: elementwise channel rescale, fully parallel. ----
    out2 = pl.pallas_call(
        _apply_gate_kernel,
        out_shape=jax.ShapeDtypeStruct((rows, HW), x.dtype),
        grid_spec=pltpu.PrefetchScalarGridSpec(
            num_scalar_prefetch=0,
            grid=(n_rt, pl.cdiv(HW, hwt2)),
            in_specs=[pl.BlockSpec((rt, 1), lambda i, j: (i, 0)),
                      pl.BlockSpec((rt, hwt2), lambda i, j: (i, j))],
            out_specs=pl.BlockSpec((rt, hwt2), lambda i, j: (i, j))),
        compiler_params=pltpu.CompilerParams(
            dimension_semantics=("parallel", "parallel"),
            vmem_limit_bytes=vmem_limit),
    )(gate, x2)

    return out2.reshape(B, C, H, W)


# --------------- Pure-JAX reference (matches the PyTorch module) -------------

def nda_cam_reference(x, conv_weight, kernel_size):
    B, C, H, W = x.shape
    pad = (kernel_size - 1) // 2
    w = jnp.asarray(conv_weight, jnp.float32).reshape(-1)
    pooled = jnp.mean(x.astype(jnp.float32), axis=(2, 3))     # (B, C)
    pooled_pad = jnp.pad(pooled, ((0, 0), (pad, pad)))        # (B, C + 2*pad)
    out_c = jnp.zeros((B, C), dtype=jnp.float32)
    for t in range(kernel_size):
        out_c = out_c + w[t] * pooled_pad[:, t:t + C]
    gate = jax.nn.sigmoid(out_c)[:, :, None, None]            # (B, C, 1, 1)
    return (x.astype(jnp.float32) * gate).astype(x.dtype)


if __name__ == "__main__":
    key = jax.random.PRNGKey(0)
    kx, kw, kx2 = jax.random.split(key, 3)

    kernel_size = 3
    conv_w = jax.random.normal(kw, (kernel_size,), dtype=jnp.float32) * 0.5

    # Test 1: fused single-pass path (slab fits VMEM).
    B, C, H, W = 2, 4, 16, 16
    x = jax.random.normal(kx, (B, C, H, W), dtype=jnp.float32)
    out = jax.block_until_ready(nda_cam(x, conv_w, kernel_size))
    ref = nda_cam_reference(x, conv_w, kernel_size)
    np.testing.assert_allclose(np.asarray(out), np.asarray(ref),
                               rtol=1e-5, atol=1e-5)

    # Test 2: two-pass streaming path with ragged row / lane tail tiles
    # (rows = 40 -> row tile 24, HW = 576 -> lane tiles of 128 + tail of 64).
    B2, C2, H2, W2 = 2, 20, 24, 24
    x2 = jax.random.normal(kx2, (B2, C2, H2, W2), dtype=jnp.float32)
    out2 = jax.block_until_ready(
        nda_cam(x2, conv_w, kernel_size, _force_two_pass=True, _max_hw_tile=128))
    ref2 = nda_cam_reference(x2, conv_w, kernel_size)
    np.testing.assert_allclose(np.asarray(out2), np.asarray(ref2),
                               rtol=1e-5, atol=1e-5)

    print("KERNEL_OK")
</pallas_src>

<mosaic_0001>
module attributes {stable_mosaic.version = 11 : i64} {
  func.func @_fused_kernel(%arg0: i32, %arg1: memref<3xf32, #tpu.memory_space<smem>>, %arg2: memref<1x4x256xf32, #tpu.memory_space<vmem>>, %arg3: memref<1x4x256xf32, #tpu.memory_space<vmem>>, %arg4: memref<13x1xf32, #tpu.memory_space<vmem>>) attributes {dimension_semantics = [#tpu.dimension_semantics<parallel>], iteration_bounds = array<i64: 2>, scalar_prefetch = 1 : i64, scratch_operands = 1 : i64, tpu.core_type = #tpu.core_type<tc>, window_params = [{transform_indices = @transform_0, window_bounds = array<i64: 1, 4, 256>}, {transform_indices = @transform_1, window_bounds = array<i64: 1, 4, 256>}]} {
    %c0 = arith.constant 0 : index
    %c0_0 = arith.constant 0 : index
    %c0_1 = arith.constant 0 : index
    %0 = vector.load %arg2[%c0, %c0_0, %c0_1] : memref<1x4x256xf32, #tpu.memory_space<vmem>>, vector<1x4x256xf32>
    %cst = arith.constant dense<0.000000e+00> : vector<1x4xf32>
    %1 = vector.multi_reduction <add>, %0, %cst [2] : vector<1x4x256xf32> to vector<1x4xf32>
    %2 = vector.shape_cast %1 : vector<1x4xf32> to vector<1x4x1xf32>
    %cst_2 = arith.constant 3.906250e-03 : f32
    %3 = vector.broadcast %cst_2 : f32 to vector<1x4x1xf32>
    %4 = arith.mulf %2, %3 : vector<1x4x1xf32>
    %cst_3 = arith.constant 0.000000e+00 : f32
    %5 = vector.broadcast %cst_3 : f32 to vector<13x1xf32>
    %c0_4 = arith.constant 0 : index
    %c0_5 = arith.constant 0 : index
    %6 = vector.load %arg4[%c0_4, %c0_5] : memref<13x1xf32, #tpu.memory_space<vmem>>, vector<13x1xf32>
    tpu.vector_store %arg4[%c0_4, %c0_5], %5 {strides = array<i32>} : memref<13x1xf32, #tpu.memory_space<vmem>>, vector<13x1xf32>,
    %7 = vector.shape_cast %4 : vector<1x4x1xf32> to vector<4x1xf32>
    %c8 = arith.constant 8 : index
    %c0_6 = arith.constant 0 : index
    %8 = vector.load %arg4[%c8, %c0_6] : memref<13x1xf32, #tpu.memory_space<vmem>>, vector<4x1xf32>
    tpu.vector_store %arg4[%c8, %c0_6], %7 {strides = array<i32>} : memref<13x1xf32, #tpu.memory_space<vmem>>, vector<4x1xf32>,
    %cst_7 = arith.constant 0.000000e+00 : f32
    %9 = vector.broadcast %cst_7 : f32 to vector<4x1xf32>
    %c0_8 = arith.constant 0 : index
    %10 = memref.load %arg1[%c0_8] : memref<3xf32, #tpu.memory_space<smem>>
    %c7 = arith.constant 7 : index
    %c0_9 = arith.constant 0 : index
    %11 = vector.load %arg4[%c7, %c0_9] : memref<13x1xf32, #tpu.memory_space<vmem>>, vector<4x1xf32>
    %12 = vector.broadcast %10 : f32 to vector<4x1xf32>
    %13 = arith.mulf %12, %11 : vector<4x1xf32>
    %14 = arith.addf %9, %13 : vector<4x1xf32>
    %c1 = arith.constant 1 : index
    %15 = memref.load %arg1[%c1] : memref<3xf32, #tpu.memory_space<smem>>
    %c8_10 = arith.constant 8 : index
    %c0_11 = arith.constant 0 : index
    %16 = vector.load %arg4[%c8_10, %c0_11] : memref<13x1xf32, #tpu.memory_space<vmem>>, vector<4x1xf32>
    %17 = vector.broadcast %15 : f32 to vector<4x1xf32>
    %18 = arith.mulf %17, %16 : vector<4x1xf32>
    %19 = arith.addf %14, %18 : vector<4x1xf32>
    %c2 = arith.constant 2 : index
    %20 = memref.load %arg1[%c2] : memref<3xf32, #tpu.memory_space<smem>>
    %c9 = arith.constant 9 : index
    %c0_12 = arith.constant 0 : index
    %21 = vector.load %arg4[%c9, %c0_12] : memref<13x1xf32, #tpu.memory_space<vmem>>, vector<4x1xf32>
    %22 = vector.broadcast %20 : f32 to vector<4x1xf32>
    %23 = arith.mulf %22, %21 : vector<4x1xf32>
    %24 = arith.addf %19, %23 : vector<4x1xf32>
    %25 = arith.negf %24 : vector<4x1xf32>
    %26 = math.exp %25 : vector<4x1xf32>
    %cst_13 = arith.constant 1.000000e+00 : f32
    %27 = vector.broadcast %cst_13 : f32 to vector<4x1xf32>
    %28 = arith.addf %27, %26 : vector<4x1xf32>
    %29 = arith.divf %27, %28 : vector<4x1xf32>
    %30 = vector.shape_cast %29 : vector<4x1xf32> to vector<1x4x1xf32>
    %31 = vector.broadcast %30 : vector<1x4x1xf32> to vector<1x4x256xf32>
    %32 = arith.mulf %0, %31 : vector<1x4x256xf32>
    %c0_14 = arith.constant 0 : index
    %c0_15 = arith.constant 0 : index
    %c0_16 = arith.constant 0 : index
    %33 = vector.load %arg3[%c0_14, %c0_15, %c0_16] : memref<1x4x256xf32, #tpu.memory_space<vmem>>, vector<1x4x256xf32>
    tpu.vector_store %arg3[%c0_14, %c0_15, %c0_16], %32 {strides = array<i32>} : memref<1x4x256xf32, #tpu.memory_space<vmem>>, vector<1x4x256xf32>,
    return
  }
  func.func @transform_0(%arg0: i32, %arg1: memref<3xf32, #tpu.memory_space<smem>>) -> (i32, i32, i32) {
    %c0_i32 = arith.constant 0 : i32
    %c0_i32_0 = arith.constant 0 : i32
    %c0_i32_1 = arith.constant 0 : i32
    return %arg0, %c0_i32, %c0_i32_0 : i32, i32, i32
  }
  func.func @transform_1(%arg0: i32, %arg1: memref<3xf32, #tpu.memory_space<smem>>) -> (i32, i32, i32) {
    %c0_i32 = arith.constant 0 : i32
    %c0_i32_0 = arith.constant 0 : i32
    %c0_i32_1 = arith.constant 0 : i32
    return %arg0, %c0_i32, %c0_i32_0 : i32, i32, i32
  }
}

</mosaic_0001>

<bundles_post_ra>
// kernel: tpu_custom_call.1
= control target key start
LH: loop header
LB: loop body
LE: loop exit
PB: predicated region body
PF: predicated region fallthrough
CT: control target
= control target key end

     0   :  { %s482_s12 = smov [#allocation4]   ;;  %s635_s0 = inlined_call_operand.hbm [shape: f32[3], index: 0, kind: input, shape index: {}]   ;;  %s636_s1 = inlined_call_operand.hbm [shape: f32[2,4,256], index: 1, kind: input, shape index: {}]   ;;  %s637_s2 = inlined_call_operand.hbm [shape: f32[2,4,256], index: 2, kind: output, shape index: {}]  }
   0x1   :  { %s8_s11 = sshll.u32 %s635_s0, 4  ;;  %s9_s11 = int_to_ptr.hbm [resolvable:$true] %s8_s11 }
   0x2   :  { %11 = dma.hbm_to_smem %s9_s11, 16, %s482_s12, [#allocation3] }
   0x3   :  { %456 = dma.done.wait [#allocation3], 16 }
   0x4   :  { %457 = vsyncadd [#allocation3], 4294967280 }
   0x5   :  { %14 = sfence }
   0x6   :  { %15 = vsyncpa [#allocation6], 0 }
   0x7   :  { %17 = vsyncpa [#allocation6 + $0x1], 0 }
   0x8   :  { %18 = vsyncpa [#allocation7], 0 }
   0x9   :  { %20 = vsyncpa [#allocation7 + $0x1], 0  ;;  %s504_s13 = smov 0   ;;  %s506_s14 = smov 0  }
   0xa   :  { %s508_s15 = smov 0   ;;  %s510_s16 = smov 0  }
   0xb LB: > { %s525_s0 = sadd.s32 4294967295, %s480_s16   ;;  %s296_s17 = sadd.s32 4294967294, %s480_s16   ;;  %s480_s16 = sphi %s510_s16, %s647_s16   ;;  %s476_s15 = sphi %s508_s15, %s646_s15   ;;  %s472_s14 = sphi %s506_s14, %s645_s14   ;;  %s468_s13 = sphi %s504_s13, %s644_s13  }
   0xc   : > { %s529_s18 = sadd.s32 1, %s480_s16   ;;  %s33_s19 = sadd.s32 1, %s476_s15 }
   0xd   : > { %s30_s20 = ssub.s32 %s480_s16, %s529_s18  ;;  %p40_p0 = scmp.ne.s32.totalorder %s476_s15, %s472_s14 }
   0xe   : > { %p31_p1 = scmp.eq.s32.totalorder %s30_s20, 0  ;;  %p41_p2 = scmp.eq.s32.totalorder %s480_s16, 0 }
   0xf   : > { %p46_p3 = scmp.ne.s32.totalorder %s472_s14, %s468_s13  ;;  %p47_p4 = scmp.eq.s32.totalorder %s525_s0, 0 }
  0x10   : > { %s541_s21 = scalar_select %p31_p1, %s476_s15, %s33_s19  }
  0x11   : > { %p543_p5 = por %p41_p2, %p40_p0  ;;  %p547_p6 = por %p47_p4, %p46_p3 }
  0x12   : > { %p70_p7 = scmp.eq.s32.totalorder %s525_s0, 1  ;;  %p76_p8 = scmp.eq.s32.totalorder %s296_s17, 1 }
  0x13   : > { %p327_p10 = scmp.lt.s32.totalorder %s480_s16, 2  ;;  %s96_s26 = sand.u32 1, %s476_s15  }
  0x14   : > { %p554_p11 = por %p70_p7, %p40_p0  ;;  %p558_p12 = por %p76_p8, %p46_p3 }
  0x15   : > { %s313_s27 = sshll.u32 %s480_s16, 3  ;;  %s299_s28 = sshll.u32 %s96_s26, 3 }
  0x16   : > { %s105_s3 = scalar_lea.hbm %s636_s1, %s313_s27  ;;  %s100_s5 = scalar_lea.vmem [#allocation5], %s299_s28 }
  0x17   : > { %s107_s4 = sshll.u32 %s105_s3, 4  ;;  %s109_s6 = sshll.u32 %s100_s5, 4  ;;  %s108_s4 = int_to_ptr.hbm [resolvable:$true] %s107_s4  ;;  %s110_s6 = int_to_ptr.vmem [resolvable:$true] %s109_s6 }
  0x18   : > { %p569_p13 = pnand %p327_p10, %p543_p5  ;;  %p302_p0 = scmp.ge.s32.totalorder %s480_s16, 1 }
  0x19   : > { %p114_p1 = scmp.lt.s32.totalorder %s480_s16, 3  ;;  %s97_s8 = scalar_lea.sflag [#allocation6], %s96_s26 }
  0x1a   : > { %s382_s9 = sshra.s32 %s108_s4, 4  ;;  %p386_p3 = pneg %p569_p13  ;;  %s383_s9 = int_to_ptr.hbm [resolvable:$true] %s382_s9 }
  0x1b   : > { %s384_s10 = scalar_lea.hbm %s383_s9, 8  ;;  %s389_s17 = scalar_lea.hbm %s636_s1, 16 }
  0x1c   : > { %p385_p2 = scmp.ne.s32.totalorder %s383_s9, %s384_s10  ;;  %p390_p5 = scmp.lt.s32.totalorder %s383_s9, %s636_s1 }
  0x1d   : > { %p391_p8 = scmp.lt.s32.totalorder %s389_s17, %s384_s10 }
  0x1e   : > { %p387_p4 = pnand %p386_p3, %p385_p2 }
  0x1f   : > { %p392_p10 = por %p391_p8, %p390_p5 }
  0x20   : > { %p388_p7 = pneg %p387_p4 }
  0x22   : > { %p393_p9 = pnand %p392_p10, %p388_p7 }
  0x24   : > { %396 = shalt.err (!%p393_p9)
}
  0x25   : > { %322 = dma.hbm_to_vmem [thread:$0]  (!%p569_p13), %s108_s4, 128, %s110_s6, %s97_s8  }
  0x26   : > { %p115_p2 = pnand %p302_p0, %p114_p1 }
  0x27   : > { %s590_s22 = sand.u32 (!%p115_p2), 1, %s472_s14  }
  0x28   : > { %118 = sbr.rel (%p115_p2) target bundleno = 343 (0x157), region = 24  ;;  %s303_s26 = sshll.u32 (!%p115_p2), %s590_s22, 3 }
  0x29   : > { %s121_s27 = scalar_lea.sflag (!%p115_p2), [#allocation6], %s590_s22  ;;  %s124_s28 = scalar_lea.vmem (!%p115_p2), [#allocation5], %s303_s26 }
  0x2d   : > { %459 = dma.done.wait (%p547_p6), %s121_s27, 128  }
  0x2e   : > { %461 = vsyncadd (%p547_p6), %s121_s27, 4294967168  ;;  %vm158_vm0 = vcmask 7168   ;;  %vm160_vm1 = vcmask 4096   ;;  %v483_v0 = vmov 0.0   ;;  %v144_v1 = vld [vmem:[%s124_s28] sm:$0xff]  ;;  %vm151_vm2 = vcmask 1043456  }
  0x2f   : > { %159 = vst.msk [vmem:[#allocation2] sm:$0xff] %vm158_vm0, %v483_v0  ;;  %v484_v7 = vmov 0   ;;  %s164_s29 = sld [smem:[#allocation4]]  ;;  %vm162_vm3 = vcmask 3072   ;;  %v485_v34 = vmov 839922192  }
  0x30   : > { %161 = vst.msk [vmem:[#allocation2 + $0x8] sm:$0x1f] %vm160_vm1, %v483_v0  ;;  %365 = vset.pattern.permute.xlu0 %v484_v7  ;;  %s305_s23 = sld [smem:[#allocation4 + $0x1]]  ;;  %v203_v35 = vunpack.c.l.s4 %v485_v34  ;;  %s314_s3 = sshll.u32 %s525_s0, 3 }
  0x31   : > { %146 = vst [vmem:[#allocation1] ss:$2 sm:$0xff] %v144_v1  ;;  %s306_s30 = sld [smem:[#allocation4 + $0x2]]  ;;  %s221_s6 = scalar_lea.hbm %s637_s2, %s314_s3 }
  0x32   : > { %v204_v36 = vunpack.c.0.s8 %v203_v35  ;;  %s143_s7 = scalar_lea.vmem [#allocation8], %s303_s26  ;;  %s225_s9 = sshll.u32 %s221_s6, 4  ;;  %s226_s9 = int_to_ptr.hbm [resolvable:$true] %s225_s9 }
  0x33   : > { %s223_s8 = sshll.u32 %s143_s7, 4  ;;  %s210_s10 = scalar_lea.sflag [#allocation7], %s590_s22  ;;  %s224_s8 = int_to_ptr.vmem [resolvable:$true] %s223_s8 }
  0x34   : > { %s426_s11 = sshra.s32 %s226_s9, 4  ;;  %s432_s19 = scalar_lea.hbm %s637_s2, 16  ;;  %s427_s11 = int_to_ptr.hbm [resolvable:$true] %s426_s11 }
  0x35   : > { %v166_v10 = vstv %s164_s29  ;;  %s428_s0 = scalar_lea.hbm %s427_s11, 8  ;;  %p433_p0 = scmp.lt.s32.totalorder %s427_s11, %s637_s2 }
  0x36   : > { %v171_v11 = vstv %s305_s23  ;;  %p429_p6 = scmp.ne.s32.totalorder %s427_s11, %s428_s0  ;;  %p434_p1 = scmp.lt.s32.totalorder %s432_s19, %s428_s0 }
  0x37   : > { %v176_v15 = vstv %s306_s30 }
  0x38   : > { %v147_v2 = vld.sshfl [vmem:[#allocation1] sm:$0xff pattern:$0x75316420]  ;;  %v148_v3 = vld.sshfl [vmem:[#allocation1 + $0x8] sm:$0xff pattern:$0x75316420]  ;;  %p430_p9 = pnand %p429_p6, %p554_p11  ;;  %p435_p3 = por %p434_p1, %p433_p0 }
  0x39   : > { %v152_v4 = vsel %vm151_vm2, %v147_v2, 0.0  ;;  %v153_v5 = vsel %vm151_vm2, %v148_v3, 0.0 }
  0x3a   : > { %v154_v6 = vadd.f32 %v153_v5, %v152_v4  ;;  %p431_p13 = pneg %p430_p9 }
  0x3c   : > { %155 = vadd.xlane.f32.xlu0 %v154_v6  ;;  %p436_p4 = pnand %p435_p3, %p431_p13 }
  0xaf   : > { %v156_v8 = vpop.xlane.xlu0 %155 }
  0xb0   : > { %v157_v9 = vmul.f32 0.00390625, %v156_v8 }
  0xb2   : > { %163 = vst.msk [vmem:[#allocation2 + $0x8] sm:$0xf] %vm162_vm3, %v157_v9 }
  0xb9   : > { %v165_v12 = vld [vmem:[#allocation2 + $0x7] sm:$0xf] }
  0xba   : > { %v170_v13 = vld [vmem:[#allocation2 + $0x8] sm:$0xf]  ;;  %v167_v16 = vmul.f32 %v166_v10, %v165_v12 }
  0xbb   : > { %v175_v14 = vld [vmem:[#allocation2 + $0x9] sm:$0xf]  ;;  %v172_v17 = vmul.f32 %v171_v11, %v170_v13 }
  0xbc   : > { %v177_v19 = vmul.f32 %v176_v15, %v175_v14 }
  0xbd   : > { %v173_v18 = vadd.f32 %v172_v17, %v167_v16 }
  0xbf   : > { %v178_v20 = vadd.f32 %v177_v19, %v173_v18 }
  0xc1   : > { %v307_v21 = vmul.f32 -1.442695, %v178_v20 }
  0xc3   : > { %366 = vpow2.f32 %v307_v21 }
  0xc9   : > { %v367_v22 = vpop.eup %366 }
  0xca   : > { %v182_v23 = vadd.f32 1.0, %v367_v22 }
  0xcc   : > { %368 = vrcp.f32 %v182_v23  ;;  %v194_v27 = vand.u32 2147483648, %v182_v23  ;;  %v192_v29 = vand.u32 2147483647, %v182_v23  ;;  %vm188_vm5 = vweird.f32 %v182_v23 }
  0xce   : > { %v195_v31 = vor.u32 1.1754944e-38, %v194_v27  ;;  %vm193_vm7 = vcmp.eq.f32.partialorder %v192_v29, 8.507059e+37 }
  0xd2   : > { %v369_v24 = vpop.eup %368 }
  0xd3   : > { %v184_v25 = vmul.f32 %v369_v24, %v182_v23  ;;  %vm189_vm4 = vweird.f32 %v369_v24 }
  0xd4   : > { %vm190_vm6 = vmor %vm188_vm5, %vm189_vm4 }
  0xd5   : > { %v185_v26 = vsub.f32 1.0, %v184_v25 }
  0xd7   : > { %v186_v28 = vmul.f32 %v369_v24, %v185_v26 }
  0xd9   : > { %v187_v30 = vadd.f32 %v369_v24, %v186_v28 }
  0xdb   : > { %v191_v32 = vsel %vm190_vm6, %v369_v24, %v187_v30 }
  0xdc   : > { %v196_v33 = vsel %vm193_vm7, %v195_v31, %v191_v32 }
  0xdd   : > { %200 = vperm.xlu0 %365, %v196_v33  }
 0x14f   : > { %v201_v37 = vpop.permute.xlu0 %200 }
 0x150   : > { %v205_v38 = vperm.slane %v201_v37, %v204_v36 }
 0x152   : > { %v207_v39 = vmul.f32 %v205_v38, %v144_v1 }
 0x154   : > { %208 = vst [vmem:[%s143_s7] sm:$0xff] %v207_v39 }
 0x155   : > { %439 = shalt.err (!%p436_p4)
}
 0x156   : > { %317 = dma.vmem_to_hbm [thread:$0]  (%p554_p11), %s224_s8, 128, %s226_s9, %s210_s10  }
 0x157 PF: > { %s237_s22 = sand.u32 1, %s468_s13   ;;  %p643_p7 = scmp.ge.s32.totalorder %s480_s16, 2 }
 0x158   : > { %s238_s27 = scalar_lea.sflag [#allocation7], %s237_s22 }
 0x159   : > { %p324_p5 = pnand %p643_p7, %p558_p12 }
 0x15b   : > { %p325_p8 = pneg %p324_p5 }
 0x15d   : > { %463 = dma.done.wait (%p325_p8), %s238_s27, 128  }
 0x15e   : > { %465 = vsyncadd (%p325_p8), %s238_s27, 4294967168  ;;  %p23_p10 = scmp.ge.s32.totalorder %s529_s18, 4   ;;  %s644_s13 = smov %s472_s14 }
 0x15f   : > { %s645_s14 = smov %s476_s15  ;;  %s646_s15 = smov %s541_s21 }
 0x160   : > { %s647_s16 = smov %s529_s18  ;;  %25 = sbr.rel (!%p23_p10) target bundleno = 11 (0xb), region = 69 }
 0x165   :  { %244 = vsyncpa [#allocation6], 1 }
 0x166   :  { %246 = vsyncpa [#allocation6 + $0x1], 1 }
 0x167   :  { %247 = vsyncpa [#allocation7], 1 }
 0x168   :  { %249 = vsyncpa [#allocation7 + $0x1], 1 }

</bundles_post_ra>
